<compile_context>
chip_gen: v7x
topology: tpu7x:2x2x1
jax: 0.10.0
libtpu: 0.0.40
codegen_flags: <defaults>
</compile_context>

<pallas_src>
import functools

import jax
import jax.numpy as jnp
from jax import lax
from jax.experimental import pallas as pl
from jax.experimental.pallas import tpu as pltpu


def _self_attention_kernel(x_ref, wq_ref, bq_ref, wk_ref, bk_ref, wv_ref, bv_ref,
                           gamma_ref, out_ref,
                           k_sc, v_sc, m_sc, l_sc, acc_sc, *, tkv):
    # x_ref:   (C, HW) f32          -- current batch element, channels-first
    # wq/wk:   (C8p, C) bf16, bq/bk: (C8p, 1) f32
    # wv:      (C, C)  bf16, bv:     (C, 1)  f32
    # gamma:   (1, 1) f32 scalar in SMEM
    # out_ref: (C, TQ) f32          -- current query tile of the output
    # k_sc: (C8p, HW) bf16, v_sc: (C, HW) bf16  (resident per batch element)
    # m_sc/l_sc: (1, TQ) f32, acc_sc: (C, TQ) f32
    qi = pl.program_id(1)
    tq = out_ref.shape[-1]
    hw = k_sc.shape[-1]
    n_kv = hw // tkv

    # ---- K/V projections (1x1 convs): compute once per batch element, keep resident ----
    @pl.when(qi == 0)
    def _():
        xb = x_ref[...].astype(jnp.bfloat16)                                   # (C, HW)
        k = jnp.dot(wk_ref[...], xb, preferred_element_type=jnp.float32)       # (C8p, HW)
        k_sc[...] = (k + bk_ref[...]).astype(jnp.bfloat16)
        v = jnp.dot(wv_ref[...], xb, preferred_element_type=jnp.float32)       # (C, HW)
        v_sc[...] = (v + bv_ref[...]).astype(jnp.bfloat16)

    # ---- Q projection for this query tile ----
    q0 = pl.multiple_of(qi * tq, tq)
    xq_f32 = x_ref[:, pl.ds(q0, tq)]                                           # (C, TQ) f32
    q = jnp.dot(wq_ref[...], xq_f32.astype(jnp.bfloat16),
                preferred_element_type=jnp.float32)
    q = (q + bq_ref[...]).astype(jnp.bfloat16)                                 # (C8p, TQ)

    # ---- online softmax over KV tiles (queries live on the lane axis) ----
    m_sc[...] = jnp.full(m_sc.shape, -jnp.inf, dtype=m_sc.dtype)
    l_sc[...] = jnp.zeros(l_sc.shape, dtype=l_sc.dtype)
    acc_sc[...] = jnp.zeros(acc_sc.shape, dtype=acc_sc.dtype)

    @pl.loop(0, n_kv)
    def _(kv):
        k0 = pl.multiple_of(kv * tkv, tkv)
        k_t = k_sc[:, pl.ds(k0, tkv)]                                          # (C8p, TKV)
        v_t = v_sc[:, pl.ds(k0, tkv)]                                          # (C,   TKV)
        # e[j, i] = <k_j, q_i>  -> (TKV, TQ); softmax (over j) runs along sublanes.
        e = lax.dot_general(k_t, q, (((0,), (0,)), ((), ())),
                            preferred_element_type=jnp.float32)                # (TKV, TQ) f32
        m_new = jnp.maximum(m_sc[...], jnp.max(e, axis=0, keepdims=True))      # (1, TQ)
        alpha = jnp.exp(m_sc[...] - m_new)                                     # (1, TQ)
        p = jnp.exp(e - m_new)                                                 # (TKV, TQ) f32
        l_sc[...] = alpha * l_sc[...] + jnp.sum(p, axis=0, keepdims=True)
        acc_sc[...] = alpha * acc_sc[...] + jnp.dot(
            v_t, p.astype(jnp.bfloat16), preferred_element_type=jnp.float32)   # (C, TQ)
        m_sc[...] = m_new

    # ---- deferred softmax normalization + gamma residual (f32) ----
    inv_l = pl.reciprocal(l_sc[...], approx=True)                              # (1, TQ)
    out = acc_sc[...] * inv_l                                                  # (C, TQ)
    out_ref[...] = (gamma_ref[0, 0] * out + xq_f32).astype(out_ref.dtype)


def self_attention(x_nchw, wq, bq, wk, bk, wv, bv, gamma, *, tq=256, tkv=512):
    """x_nchw: (B, C, H, W) float32. Returns (B, C, H, W) float32.

    tq / tkv: query / key-value tile sizes (multiples of 128; 256+ fills the v6e/v7x MXU,
    128 is enough on v5e). They are clamped to HW and must divide it.
    """
    B, C, H, W = x_nchw.shape
    HW = H * W
    C8 = wq.shape[0]

    tq = min(tq, HW)
    tkv = min(tkv, HW)
    assert HW % tq == 0 and HW % tkv == 0, (HW, tq, tkv)

    # channels-first (B, C, HW): a free reshape of NCHW -- no HBM transpose round-trip.
    x_f = x_nchw.reshape(B, C, HW).astype(jnp.float32)

    # pad query/key output channels up to a sublane multiple (exact: zero rows contribute 0).
    C8p = max(8, ((C8 + 7) // 8) * 8)

    def pad_qk(w, b):
        w = w.astype(jnp.float32)
        b = b.astype(jnp.float32)
        if C8p > C8:
            w = jnp.pad(w, ((0, C8p - C8), (0, 0)))
            b = jnp.pad(b, (0, C8p - C8))
        return w.astype(jnp.bfloat16), b.reshape(C8p, 1)

    wq_b, bq2 = pad_qk(wq, bq)
    wk_b, bk2 = pad_qk(wk, bk)
    wv_b = wv.astype(jnp.bfloat16)
    bv2 = bv.astype(jnp.float32).reshape(C, 1)
    gamma2 = jnp.asarray(gamma, jnp.float32).reshape(1, 1)

    # VMEM budget for the chosen tiles (with headroom), capped well under physical VMEM.
    vmem_bytes = (
        2 * C * HW * 4                # x block (double-buffered), f32
        + (C8p + C) * HW * 2          # resident K/V scratch, bf16
        + 2 * C * tq * 4              # out tiles (double-buffered), f32
        + C * tq * 4                  # acc scratch, f32
        + 6 * tkv * tq * 4            # e / p temporaries + slack
        + (2 * C8p * C + C * C) * 2   # weights, bf16
        + (2 * C8p + C) * 4           # biases
    )
    vmem_limit = int(min(96 * 2**20, max(2 * vmem_bytes, 16 * 2**20)))

    kernel = functools.partial(_self_attention_kernel, tkv=tkv)
    weight_map = lambda b, qi: (0, 0)

    out_f = pl.pallas_call(
        kernel,
        out_shape=jax.ShapeDtypeStruct((B, C, HW), jnp.float32),
        grid_spec=pltpu.PrefetchScalarGridSpec(
            num_scalar_prefetch=0,
            grid=(B, HW // tq),
            in_specs=[
                pl.BlockSpec((None, C, HW), lambda b, qi: (b, 0, 0)),   # x (per batch, resident)
                pl.BlockSpec((C8p, C), weight_map),                     # wq
                pl.BlockSpec((C8p, 1), weight_map),                     # bq
                pl.BlockSpec((C8p, C), weight_map),                     # wk
                pl.BlockSpec((C8p, 1), weight_map),                     # bk
                pl.BlockSpec((C, C), weight_map),                       # wv
                pl.BlockSpec((C, 1), weight_map),                       # bv
                pl.BlockSpec(memory_space=pltpu.SMEM),                  # gamma scalar
            ],
            out_specs=pl.BlockSpec((None, C, tq), lambda b, qi: (b, 0, qi)),
            scratch_shapes=[
                pltpu.VMEM((C8p, HW), jnp.bfloat16),   # resident K
                pltpu.VMEM((C, HW), jnp.bfloat16),     # resident V
                pltpu.VMEM((1, tq), jnp.float32),      # running max m
                pltpu.VMEM((1, tq), jnp.float32),      # running sum l
                pltpu.VMEM((C, tq), jnp.float32),      # output accumulator
            ],
        ),
        compiler_params=pltpu.CompilerParams(
            # qi must be sequential (per-batch K/V scratch is built at qi == 0); batch is parallel.
            dimension_semantics=("parallel", "arbitrary"),
            vmem_limit_bytes=vmem_limit,
        ),
    )(x_f, wq_b, bq2, wk_b, bk2, wv_b, bv2, gamma2)

    return out_f.reshape(B, C, H, W)


def _reference(x, wq, bq, wk, bk, wv, bv, gamma):
    """Pure-JAX f32 reference matching the PyTorch forward exactly."""
    B, C, H, W = x.shape
    HW = H * W

    def conv1x1(x, w, b):  # (B,C,H,W) x (Co,Ci) -> (B,Co,HW)
        return jnp.einsum('bchw,oc->bohw', x, w).reshape(B, -1, HW) + b[None, :, None]

    q = conv1x1(x, wq, bq)                      # (B, C8, HW)
    k = conv1x1(x, wk, bk)                      # (B, C8, HW)
    v = conv1x1(x, wv, bv)                      # (B, C,  HW)
    energy = jnp.einsum('bcn,bcm->bnm', q, k)   # (B, HW, HW)  == q^T @ k
    attn = jax.nn.softmax(energy, axis=-1)
    out = jnp.einsum('bcm,bnm->bcn', v, attn)   # == v @ attn^T
    out = out.reshape(B, C, H, W)
    return gamma * out + x


if __name__ == "__main__":
    key = jax.random.PRNGKey(0)
    B, C, H, W = 2, 16, 16, 16          # HW = 256 -> 2 query tiles x 2 KV tiles at 128/128
    C8 = C // 8

    k0, k1, k2, k3, k4, k5, k6 = jax.random.split(key, 7)
    x = jax.random.normal(k0, (B, C, H, W), jnp.float32)

    # Deterministic synthetic parameters (shapes per nn.Conv2d(kernel_size=1)).
    wq = 0.1 * jax.random.normal(k1, (C8, C), jnp.float32)
    bq = 0.1 * jax.random.normal(k2, (C8,), jnp.float32)
    wk = 0.1 * jax.random.normal(k3, (C8, C), jnp.float32)
    bk = 0.1 * jax.random.normal(k4, (C8,), jnp.float32)
    wv = 0.1 * jax.random.normal(k5, (C, C), jnp.float32)
    bv = 0.1 * jax.random.normal(k6, (C,), jnp.float32)
    # nn.Parameter(torch.zeros(1)) would make the output == x; use a nonzero value so the
    # attention path is actually exercised.
    gamma = jnp.float32(0.5)

    out = self_attention(x, wq, bq, wk, bk, wv, bv, gamma, tq=128, tkv=128)
    out = jax.block_until_ready(out)

    ref = _reference(x, wq, bq, wk, bk, wv, bv, gamma)
    assert out.shape == (B, C, H, W)
    err = float(jnp.max(jnp.abs(out - ref)))
    # bf16 MXU inputs (weights, activations, p tile) vs f32 reference -> relaxed tolerance.
    assert jnp.allclose(out, ref, atol=2e-2, rtol=2e-2), err

    print("KERNEL_OK")
</pallas_src>

<mosaic_0001>
module attributes {stable_mosaic.version = 11 : i64} {
  func.func @_self_attention_kernel(%arg0: i32, %arg1: i32, %arg2: memref<1x16x256xf32, #tpu.memory_space<vmem>>, %arg3: memref<8x16xbf16, #tpu.memory_space<vmem>>, %arg4: memref<8x1xf32, #tpu.memory_space<vmem>>, %arg5: memref<8x16xbf16, #tpu.memory_space<vmem>>, %arg6: memref<8x1xf32, #tpu.memory_space<vmem>>, %arg7: memref<16x16xbf16, #tpu.memory_space<vmem>>, %arg8: memref<16x1xf32, #tpu.memory_space<vmem>>, %arg9: memref<1x1xf32, #tpu.memory_space<smem>>, %arg10: memref<1x16x128xf32, #tpu.memory_space<vmem>>, %arg11: memref<8x256xbf16, #tpu.memory_space<vmem>>, %arg12: memref<16x256xbf16, #tpu.memory_space<vmem>>, %arg13: memref<1x128xf32, #tpu.memory_space<vmem>>, %arg14: memref<1x128xf32, #tpu.memory_space<vmem>>, %arg15: memref<16x128xf32, #tpu.memory_space<vmem>>) attributes {dimension_semantics = [#tpu.dimension_semantics<parallel>, #tpu.dimension_semantics<arbitrary>], iteration_bounds = array<i64: 2, 2>, scalar_prefetch = 0 : i64, scratch_operands = 5 : i64, tpu.core_type = #tpu.core_type<tc>, window_params = [{transform_indices = @transform_0, window_bounds = array<i64: 1, 16, 256>}, {pipeline_mode = #tpu.pipeline_mode<synchronous>, transform_indices = @transform_1, window_bounds = array<i64: 8, 16>}, {pipeline_mode = #tpu.pipeline_mode<synchronous>, transform_indices = @transform_2, window_bounds = array<i64: 8, 1>}, {pipeline_mode = #tpu.pipeline_mode<synchronous>, transform_indices = @transform_3, window_bounds = array<i64: 8, 16>}, {pipeline_mode = #tpu.pipeline_mode<synchronous>, transform_indices = @transform_4, window_bounds = array<i64: 8, 1>}, {pipeline_mode = #tpu.pipeline_mode<synchronous>, transform_indices = @transform_5, window_bounds = array<i64: 16, 16>}, {pipeline_mode = #tpu.pipeline_mode<synchronous>, transform_indices = @transform_6, window_bounds = array<i64: 16, 1>}, {transform_indices = @transform_7, window_bounds = array<i64: 1, 1>}, {transform_indices = @transform_8, window_bounds = array<i64: 1, 16, 128>}]} {
    %c0_i32 = arith.constant 0 : i32
    %0 = arith.cmpi eq, %arg1, %c0_i32 : i32
    %1 = arith.extui %0 : i1 to i32
    %c0_i32_0 = arith.constant 0 : i32
    %2 = arith.cmpi ne, %1, %c0_i32_0 : i32
    scf.if %2 {
      %c0_26 = arith.constant 0 : index
      %c0_27 = arith.constant 0 : index
      %c0_28 = arith.constant 0 : index
      %34 = vector.load %arg2[%c0_26, %c0_27, %c0_28] : memref<1x16x256xf32, #tpu.memory_space<vmem>>, vector<1x16x256xf32>
      %35 = vector.shape_cast %34 : vector<1x16x256xf32> to vector<16x256xf32>
      %36 = arith.truncf %35 : vector<16x256xf32> to vector<16x256xbf16>
      %c0_29 = arith.constant 0 : index
      %c0_30 = arith.constant 0 : index
      %37 = vector.load %arg5[%c0_29, %c0_30] : memref<8x16xbf16, #tpu.memory_space<vmem>>, vector<8x16xbf16>
      %cst_31 = arith.constant dense<0.000000e+00> : vector<8x256xf32>
      %38 = tpu.matmul %37, %36, %cst_31 {dimension_numbers = #tpu.dot_dimension_numbers<[1], [0], [0], [1], [0, 0, 1, 1], [], []>} : vector<8x16xbf16>, vector<16x256xbf16>, vector<8x256xf32> -> vector<8x256xf32>
      %c0_32 = arith.constant 0 : index
      %c0_33 = arith.constant 0 : index
      %39 = vector.load %arg6[%c0_32, %c0_33] : memref<8x1xf32, #tpu.memory_space<vmem>>, vector<8x1xf32>
      %40 = vector.broadcast %39 : vector<8x1xf32> to vector<8x256xf32>
      %41 = arith.addf %38, %40 : vector<8x256xf32>
      %42 = arith.truncf %41 : vector<8x256xf32> to vector<8x256xbf16>
      %c0_34 = arith.constant 0 : index
      %c0_35 = arith.constant 0 : index
      %43 = vector.load %arg11[%c0_34, %c0_35] : memref<8x256xbf16, #tpu.memory_space<vmem>>, vector<8x256xbf16>
      tpu.vector_store %arg11[%c0_34, %c0_35], %42 {strides = array<i32>} : memref<8x256xbf16, #tpu.memory_space<vmem>>, vector<8x256xbf16>,
      %c0_36 = arith.constant 0 : index
      %c0_37 = arith.constant 0 : index
      %44 = vector.load %arg7[%c0_36, %c0_37] : memref<16x16xbf16, #tpu.memory_space<vmem>>, vector<16x16xbf16>
      %cst_38 = arith.constant dense<0.000000e+00> : vector<16x256xf32>
      %45 = tpu.matmul %44, %36, %cst_38 {dimension_numbers = #tpu.dot_dimension_numbers<[1], [0], [0], [1], [0, 0, 1, 1], [], []>} : vector<16x16xbf16>, vector<16x256xbf16>, vector<16x256xf32> -> vector<16x256xf32>
      %c0_39 = arith.constant 0 : index
      %c0_40 = arith.constant 0 : index
      %46 = vector.load %arg8[%c0_39, %c0_40] : memref<16x1xf32, #tpu.memory_space<vmem>>, vector<16x1xf32>
      %47 = vector.broadcast %46 : vector<16x1xf32> to vector<16x256xf32>
      %48 = arith.addf %45, %47 : vector<16x256xf32>
      %49 = arith.truncf %48 : vector<16x256xf32> to vector<16x256xbf16>
      %c0_41 = arith.constant 0 : index
      %c0_42 = arith.constant 0 : index
      %50 = vector.load %arg12[%c0_41, %c0_42] : memref<16x256xbf16, #tpu.memory_space<vmem>>, vector<16x256xbf16>
      tpu.vector_store %arg12[%c0_41, %c0_42], %49 {strides = array<i32>} : memref<16x256xbf16, #tpu.memory_space<vmem>>, vector<16x256xbf16>,
    } else {
    }
    %c128_i32 = arith.constant 128 : i32
    %3 = arith.muli %arg1, %c128_i32 : i32
    %4 = tpu.assume_multiple %3, 128 : i32
    %c0 = arith.constant 0 : index
    %c0_1 = arith.constant 0 : index
    %5 = arith.index_cast %4 : i32 to index
    %6 = vector.load %arg2[%c0, %c0_1, %5] : memref<1x16x256xf32, #tpu.memory_space<vmem>>, vector<1x16x128xf32>
    %7 = vector.shape_cast %6 : vector<1x16x128xf32> to vector<16x128xf32>
    %c0_2 = arith.constant 0 : index
    %c0_3 = arith.constant 0 : index
    %8 = vector.load %arg3[%c0_2, %c0_3] : memref<8x16xbf16, #tpu.memory_space<vmem>>, vector<8x16xbf16>
    %9 = arith.truncf %7 : vector<16x128xf32> to vector<16x128xbf16>
    %cst = arith.constant dense<0.000000e+00> : vector<8x128xf32>
    %10 = tpu.matmul %8, %9, %cst {dimension_numbers = #tpu.dot_dimension_numbers<[1], [0], [0], [1], [0, 0, 1, 1], [], []>} : vector<8x16xbf16>, vector<16x128xbf16>, vector<8x128xf32> -> vector<8x128xf32>
    %c0_4 = arith.constant 0 : index
    %c0_5 = arith.constant 0 : index
    %11 = vector.load %arg4[%c0_4, %c0_5] : memref<8x1xf32, #tpu.memory_space<vmem>>, vector<8x1xf32>
    %12 = vector.broadcast %11 : vector<8x1xf32> to vector<8x128xf32>
    %13 = arith.addf %10, %12 : vector<8x128xf32>
    %14 = arith.truncf %13 : vector<8x128xf32> to vector<8x128xbf16>
    %cst_6 = arith.constant 0xFF800000 : f32
    %15 = vector.broadcast %cst_6 : f32 to vector<1x128xf32>
    %c0_7 = arith.constant 0 : index
    %c0_8 = arith.constant 0 : index
    %16 = vector.load %arg13[%c0_7, %c0_8] : memref<1x128xf32, #tpu.memory_space<vmem>>, vector<1x128xf32>
    tpu.vector_store %arg13[%c0_7, %c0_8], %15 {strides = array<i32>} : memref<1x128xf32, #tpu.memory_space<vmem>>, vector<1x128xf32>,
    %cst_9 = arith.constant 0.000000e+00 : f32
    %17 = vector.broadcast %cst_9 : f32 to vector<1x128xf32>
    %c0_10 = arith.constant 0 : index
    %c0_11 = arith.constant 0 : index
    %18 = vector.load %arg14[%c0_10, %c0_11] : memref<1x128xf32, #tpu.memory_space<vmem>>, vector<1x128xf32>
    tpu.vector_store %arg14[%c0_10, %c0_11], %17 {strides = array<i32>} : memref<1x128xf32, #tpu.memory_space<vmem>>, vector<1x128xf32>,
    %cst_12 = arith.constant 0.000000e+00 : f32
    %19 = vector.broadcast %cst_12 : f32 to vector<16x128xf32>
    %c0_13 = arith.constant 0 : index
    %c0_14 = arith.constant 0 : index
    %20 = vector.load %arg15[%c0_13, %c0_14] : memref<16x128xf32, #tpu.memory_space<vmem>>, vector<16x128xf32>
    tpu.vector_store %arg15[%c0_13, %c0_14], %19 {strides = array<i32>} : memref<16x128xf32, #tpu.memory_space<vmem>>, vector<16x128xf32>,
    %c0_i32_15 = arith.constant 0 : i32
    %c2_i32 = arith.constant 2 : i32
    %21 = arith.addi %c0_i32_15, %c2_i32 : i32
    %c1_i32 = arith.constant 1 : i32
    scf.for %arg16 = %c0_i32_15 to %21 step %c1_i32  : i32 {
      %c1_i32_26 = arith.constant 1 : i32
      %34 = arith.muli %arg16, %c1_i32_26 : i32
      %c0_i32_27 = arith.constant 0 : i32
      %35 = arith.addi %c0_i32_27, %34 : i32
      %c128_i32_28 = arith.constant 128 : i32
      %36 = arith.muli %35, %c128_i32_28 : i32
      %37 = tpu.assume_multiple %36, 128 : i32
      %c0_29 = arith.constant 0 : index
      %38 = arith.index_cast %37 : i32 to index
      %39 = vector.load %arg11[%c0_29, %38] : memref<8x256xbf16, #tpu.memory_space<vmem>>, vector<8x128xbf16>
      %c0_30 = arith.constant 0 : index
      %40 = arith.index_cast %37 : i32 to index
      %41 = vector.load %arg12[%c0_30, %40] : memref<16x256xbf16, #tpu.memory_space<vmem>>, vector<16x128xbf16>
      %cst_31 = arith.constant dense<0.000000e+00> : vector<128x128xf32>
      %42 = tpu.matmul %39, %14, %cst_31 {dimension_numbers = #tpu.dot_dimension_numbers<[0], [0], [1], [1], [0, 1, 1, 1], [], []>} : vector<8x128xbf16>, vector<8x128xbf16>, vector<128x128xf32> -> vector<128x128xf32>
      %c0_32 = arith.constant 0 : index
      %c0_33 = arith.constant 0 : index
      %43 = vector.load %arg13[%c0_32, %c0_33] : memref<1x128xf32, #tpu.memory_space<vmem>>, vector<1x128xf32>
      %cst_34 = arith.constant dense<0xFF800000> : vector<128xf32>
      %44 = vector.multi_reduction <maximumf>, %42, %cst_34 [0] : vector<128x128xf32> to vector<128xf32>
      %45 = vector.shape_cast %44 : vector<128xf32> to vector<1x128xf32>
      %46 = arith.maximumf %43, %45 : vector<1x128xf32>
      %c0_35 = arith.constant 0 : index
      %c0_36 = arith.constant 0 : index
      %47 = vector.load %arg13[%c0_35, %c0_36] : memref<1x128xf32, #tpu.memory_space<vmem>>, vector<1x128xf32>
      %48 = arith.subf %47, %46 : vector<1x128xf32>
      %49 = math.exp %48 : vector<1x128xf32>
      %50 = vector.broadcast %46 : vector<1x128xf32> to vector<128x128xf32>
      %51 = arith.subf %42, %50 : vector<128x128xf32>
      %52 = math.exp %51 : vector<128x128xf32>
      %c0_37 = arith.constant 0 : index
      %c0_38 = arith.constant 0 : index
      %53 = vector.load %arg14[%c0_37, %c0_38] : memref<1x128xf32, #tpu.memory_space<vmem>>, vector<1x128xf32>
      %54 = arith.mulf %49, %53 : vector<1x128xf32>
      %cst_39 = arith.constant dense<0.000000e+00> : vector<128xf32>
      %55 = vector.multi_reduction <add>, %52, %cst_39 [0] : vector<128x128xf32> to vector<128xf32>
      %56 = vector.shape_cast %55 : vector<128xf32> to vector<1x128xf32>
      %57 = arith.addf %54, %56 : vector<1x128xf32>
      %c0_40 = arith.constant 0 : index
      %c0_41 = arith.constant 0 : index
      %58 = vector.load %arg14[%c0_40, %c0_41] : memref<1x128xf32, #tpu.memory_space<vmem>>, vector<1x128xf32>
      tpu.vector_store %arg14[%c0_40, %c0_41], %57 {strides = array<i32>} : memref<1x128xf32, #tpu.memory_space<vmem>>, vector<1x128xf32>,
      %c0_42 = arith.constant 0 : index
      %c0_43 = arith.constant 0 : index
      %59 = vector.load %arg15[%c0_42, %c0_43] : memref<16x128xf32, #tpu.memory_space<vmem>>, vector<16x128xf32>
      %60 = vector.broadcast %49 : vector<1x128xf32> to vector<16x128xf32>
      %61 = arith.mulf %60, %59 : vector<16x128xf32>
      %62 = arith.truncf %52 : vector<128x128xf32> to vector<128x128xbf16>
      %cst_44 = arith.constant dense<0.000000e+00> : vector<16x128xf32>
      %63 = tpu.matmul %41, %62, %cst_44 {dimension_numbers = #tpu.dot_dimension_numbers<[1], [0], [0], [1], [0, 0, 1, 1], [], []>} : vector<16x128xbf16>, vector<128x128xbf16>, vector<16x128xf32> -> vector<16x128xf32>
      %64 = arith.addf %61, %63 : vector<16x128xf32>
      %c0_45 = arith.constant 0 : index
      %c0_46 = arith.constant 0 : index
      %65 = vector.load %arg15[%c0_45, %c0_46] : memref<16x128xf32, #tpu.memory_space<vmem>>, vector<16x128xf32>
      tpu.vector_store %arg15[%c0_45, %c0_46], %64 {strides = array<i32>} : memref<16x128xf32, #tpu.memory_space<vmem>>, vector<16x128xf32>,
      %c0_47 = arith.constant 0 : index
      %c0_48 = arith.constant 0 : index
      %66 = vector.load %arg13[%c0_47, %c0_48] : memref<1x128xf32, #tpu.memory_space<vmem>>, vector<1x128xf32>
      tpu.vector_store %arg13[%c0_47, %c0_48], %46 {strides = array<i32>} : memref<1x128xf32, #tpu.memory_space<vmem>>, vector<1x128xf32>,
    }
    %c2_i32_16 = arith.constant 2 : i32
    %c0_17 = arith.constant 0 : index
    %c0_18 = arith.constant 0 : index
    %22 = vector.load %arg14[%c0_17, %c0_18] : memref<1x128xf32, #tpu.memory_space<vmem>>, vector<1x128xf32>
    %23 = tpu.reciprocal %22 {approx = true} : vector<1x128xf32> -> vector<1x128xf32>
    %c0_19 = arith.constant 0 : index
    %c0_20 = arith.constant 0 : index
    %24 = vector.load %arg15[%c0_19, %c0_20] : memref<16x128xf32, #tpu.memory_space<vmem>>, vector<16x128xf32>
    %25 = vector.broadcast %23 : vector<1x128xf32> to vector<16x128xf32>
    %26 = arith.mulf %24, %25 : vector<16x128xf32>
    %c0_21 = arith.constant 0 : index
    %c0_22 = arith.constant 0 : index
    %27 = memref.load %arg9[%c0_21, %c0_22] : memref<1x1xf32, #tpu.memory_space<smem>>
    %28 = vector.broadcast %27 : f32 to vector<16x128xf32>
    %29 = arith.mulf %28, %26 : vector<16x128xf32>
    %30 = arith.addf %29, %7 : vector<16x128xf32>
    %c0_23 = arith.constant 0 : index
    %c0_24 = arith.constant 0 : index
    %c0_25 = arith.constant 0 : index
    %31 = vector.load %arg10[%c0_23, %c0_24, %c0_25] : memref<1x16x128xf32, #tpu.memory_space<vmem>>, vector<1x16x128xf32>
    %32 = vector.shape_cast %31 : vector<1x16x128xf32> to vector<16x128xf32>
    %33 = vector.shape_cast %30 : vector<16x128xf32> to vector<1x16x128xf32>
    tpu.vector_store %arg10[%c0_23, %c0_24, %c0_25], %33 {strides = array<i32>} : memref<1x16x128xf32, #tpu.memory_space<vmem>>, vector<1x16x128xf32>,
    return
  }
  func.func @transform_0(%arg0: i32, %arg1: i32) -> (i32, i32, i32) {
    %c0_i32 = arith.constant 0 : i32
    %c0_i32_0 = arith.constant 0 : i32
    %c0_i32_1 = arith.constant 0 : i32
    return %arg0, %c0_i32, %c0_i32_0 : i32, i32, i32
  }
  func.func @transform_1(%arg0: i32, %arg1: i32) -> (i32, i32) {
    %c0_i32 = arith.constant 0 : i32
    %c0_i32_0 = arith.constant 0 : i32
    %c0_i32_1 = arith.constant 0 : i32
    return %c0_i32, %c0_i32_0 : i32, i32
  }
  func.func @transform_2(%arg0: i32, %arg1: i32) -> (i32, i32) {
    %c0_i32 = arith.constant 0 : i32
    %c0_i32_0 = arith.constant 0 : i32
    %c0_i32_1 = arith.constant 0 : i32
    return %c0_i32, %c0_i32_0 : i32, i32
  }
  func.func @transform_3(%arg0: i32, %arg1: i32) -> (i32, i32) {
    %c0_i32 = arith.constant 0 : i32
    %c0_i32_0 = arith.constant 0 : i32
    %c0_i32_1 = arith.constant 0 : i32
    return %c0_i32, %c0_i32_0 : i32, i32
  }
  func.func @transform_4(%arg0: i32, %arg1: i32) -> (i32, i32) {
    %c0_i32 = arith.constant 0 : i32
    %c0_i32_0 = arith.constant 0 : i32
    %c0_i32_1 = arith.constant 0 : i32
    return %c0_i32, %c0_i32_0 : i32, i32
  }
  func.func @transform_5(%arg0: i32, %arg1: i32) -> (i32, i32) {
    %c0_i32 = arith.constant 0 : i32
    %c0_i32_0 = arith.constant 0 : i32
    %c0_i32_1 = arith.constant 0 : i32
    return %c0_i32, %c0_i32_0 : i32, i32
  }
  func.func @transform_6(%arg0: i32, %arg1: i32) -> (i32, i32) {
    %c0_i32 = arith.constant 0 : i32
    %c0_i32_0 = arith.constant 0 : i32
    %c0_i32_1 = arith.constant 0 : i32
    return %c0_i32, %c0_i32_0 : i32, i32
  }
  func.func @transform_7(%arg0: i32, %arg1: i32) -> (i32, i32) {
    %c0_i32 = arith.constant 0 : i32
    %c0_i32_0 = arith.constant 0 : i32
    %c0_i32_1 = arith.constant 0 : i32
    return %c0_i32, %c0_i32_0 : i32, i32
  }
  func.func @transform_8(%arg0: i32, %arg1: i32) -> (i32, i32, i32) {
    %c0_i32 = arith.constant 0 : i32
    %c0_i32_0 = arith.constant 0 : i32
    return %arg0, %c0_i32, %arg1 : i32, i32, i32
  }
}

</mosaic_0001>

<bundles_post_ra>
// kernel: tpu_custom_call.1
= control target key start
LH: loop header
LB: loop body
LE: loop exit
PB: predicated region body
PF: predicated region fallthrough
CT: control target
= control target key end

     0   :  { %s1822_s0 = inlined_call_operand.hbm [shape: f32[2,16,256], index: 0, kind: input, shape index: {}]   ;;  %s1823_s1 = inlined_call_operand.vmem [shape: bf16[8,16], index: 1, kind: input, shape index: {}]   ;;  %s1824_s2 = inlined_call_operand.vmem [shape: f32[8,1], index: 2, kind: input, shape index: {}]   ;;  %s1825_s3 = inlined_call_operand.vmem [shape: bf16[8,16], index: 3, kind: input, shape index: {}]   ;;  %s1826_s4 = inlined_call_operand.vmem [shape: f32[8,1], index: 4, kind: input, shape index: {}]   ;;  %s1827_s5 = inlined_call_operand.vmem [shape: bf16[16,16], index: 5, kind: input, shape index: {}]   ;;  %s1828_s6 = inlined_call_operand.vmem [shape: f32[16,1], index: 6, kind: input, shape index: {}]   ;;  %s1829_s7 = inlined_call_operand.<no memory space> [shape: f32[1,1], index: 7, kind: input, shape index: {}]   ;;  %s1830_s8 = inlined_call_operand.hbm [shape: f32[2,16,256], index: 8, kind: output, shape index: {}]  }
   0x1   :  { %1837 = sst [smem:[#allocation18_spill]] %s1830_s8 }
   0x2   :  { %13 = sst [smem:[#allocation7]] %s1829_s7 }
   0x3   :  { %14 = vsyncpa [#allocation9], 0 }
   0x4   :  { %16 = vsyncpa [#allocation9 + $0x1], 0 }
   0x5   :  { %17 = vsyncpa [#allocation10], 0 }
   0x6   :  { %19 = vsyncpa [#allocation10 + $0x1], 0  ;;  %s1490_s29 = smov 0   ;;  %s1492_s30 = smov 0  }
   0x7   :  { %s1494_s9 = smov 0   ;;  %s1496_s10 = smov 0  }
   0x8   :  { %s1498_s11 = smov 0   ;;  %s1500_s12 = smov 0  }
   0x9   :  { %s1502_s13 = smov 0   ;;  %s1504_s14 = smov 0  }
   0xa   :  { %s1506_s7 = smov 0   ;;  %s1508_s15 = smov 0  }
   0xb   :  { %s1510_s16 = smov 0  }
   0xc LB: > { %1838 = sst [smem:[#allocation14_spill]] %s1414_s7  ;;  %s1002_s17 = sadd.s32 4294967295, %s1422_s16   ;;  %s1422_s16 = sphi %s1510_s16, %s25_s16   ;;  %s1418_s15 = sphi %s1508_s15, %s1855_s15   ;;  %s1414_s7 = sphi %s1506_s7, %s1854_s7   ;;  %s1410_s14 = sphi %s1504_s14, %s1853_s14   ;;  %s1406_s13 = sphi %s1502_s13, %s1852_s13   ;;  %s1402_s12 = sphi %s1500_s12, %s1861_s12   ;;  %s1398_s11 = sphi %s1498_s11, %s1860_s11   ;;  %s1394_s10 = sphi %s1496_s10, %s1859_s10   ;;  %s1390_s9 = sphi %s1494_s9, %s1858_s9   ;;  %s1386_s30 = sphi %s1492_s30, %s1857_s30   ;;  %s1382_s29 = sphi %s1490_s29, %s1856_s29  }
   0xd   : > { %1839 = sst [smem:[#allocation15_spill]] %s1418_s15  ;;  %s1003_s18 = sadd.s32 4294967294, %s1422_s16  }
   0xe   : > { %s34_s19 = sadd.s32 1, %s1414_s7  ;;  %s37_s20 = sadd.s32 1, %s1418_s15 }
   0xf   : > { %p35_p0 = scmp.ge.s32.totalorder %s34_s19, 2  ;;  %s44_s21 = sadd.s32 1, %s1402_s12 }
  0x10   : > { %p51_p1 = scmp.ne.s32.totalorder %s1402_s12, %s1398_s11  ;;  %p52_p2 = scmp.eq.s32.totalorder %s1422_s16, 0 }
  0x11   : > { %s1863_s19 = smov (%p35_p0, %s34_s19), 0  ;;  %s1865_s20 = smov (!%p35_p0, %s37_s20), %s1418_s15 }
  0x12   : > { %1840 = sst [smem:[#allocation16_spill]] %s1863_s19  ;;  %p1554_p3 = por %p52_p2, %p51_p1 }
  0x13   : > { %p57_p4 = scmp.ne.s32.totalorder %s1398_s11, %s1394_s10  ;;  %p39_p5 = scmp.ge.s32.totalorder %s1865_s20, 2 }
  0x14   : > { %p58_p6 = scmp.eq.s32.totalorder %s1002_s17, 0  ;;  %s215_s23 = ssub.s32 %s1414_s7, %s1863_s19 }
  0x15   : > { %s219_s24 = sadd.s32 1, %s1390_s9  ;;  %s1867_s20 = smov (%p39_p5, %s1865_s20), 0 }
  0x16   : > { %1842 = sst [smem:[#allocation17_spill]] %s1867_s20  ;;  %p1564_p7 = por %p58_p6, %p57_p4 }
  0x17   : > { %p229_p8 = scmp.ne.s32.totalorder %s1390_s9, %s1386_s30  ;;  %s41_s26 = ssub.s32 %s1418_s15, %s1867_s20 }
  0x18   : > { %p230_p9 = scmp.eq.s32.totalorder %s1002_s17, 3  ;;  %p42_p10 = scmp.eq.s32.totalorder %s41_s26, 0 }
  0x19   : > { %s216_s27 = sor.u32 %s215_s23, %s41_s26  ;;  %p235_p13 = scmp.ne.s32.totalorder %s1386_s30, %s1382_s29 }
  0x1a   : > { %p217_p11 = scmp.eq.s32.totalorder %s216_s27, 0  ;;  %p1572_p12 = por %p230_p9, %p229_p8 }
  0x1b   : > { %s1577_s10 = scalar_select %p42_p10, %s1402_s12, %s44_s21  }
  0x1c   : > { %s1844_s28 = scalar_select %p1572_p12, 1, 0 }
  0x1d   : > { %s1580_s19 = scalar_select %p217_p11, %s1390_s9, %s219_s24  }
  0x1e   : > { %p236_p0 = scmp.eq.s32.totalorder %s1003_s18, 3  ;;  %p1115_p1 = scmp.lt.s32.totalorder %s1422_s16, 4 }
  0x1f   : > { %s277_s17 = sand.u32 1, %s1402_s12   ;;  %s1036_s26 = sshll.u32 %s1418_s15, 9 }
  0x20   : > { %p1585_p2 = por %p236_p0, %p235_p13  ;;  %s1006_s23 = sshll.u32 %s277_s17, 5 }
  0x21   : > { %s1594_s8 = scalar_lea.hbm %s1822_s0, %s1036_s26  ;;  %s281_s21 = scalar_lea.vmem [#allocation8], %s1006_s23 }
  0x22   : > { %s1845_s7 = scalar_select %p1585_p2, 1, 0 }
  0x23   : > { %s288_s24 = sshll.u32 %s281_s21, 4  ;;  %p1600_p4 = pnand %p1115_p1, %p1554_p3  ;;  %s1596_s24 = int_to_ptr.vmem [resolvable:$true] %s288_s24 }
  0x24   : > { %s1605_s15 = scalar_lea.sflag [#allocation9], %s277_s17  ;;  %s1266_s20 = scalar_lea.hbm %s1594_s8, 512 }
  0x25   : > { %p1267_p6 = scmp.ne.s32.totalorder %s1594_s8, %s1266_s20  ;;  %p1268_p8 = pneg %p1600_p4 }
  0x26   : > { %s1271_s22 = scalar_lea.hbm %s1822_s0, 1024  ;;  %p1272_p3 = scmp.lt.u32.totalorder %s1594_s8, %s1822_s0 }
  0x27   : > { %p1269_p9 = pnand %p1268_p8, %p1267_p6  ;;  %p1273_p11 = scmp.lt.u32.totalorder %s1271_s22, %s1266_s20 }
  0x28   : > { %p1275_p0 = scmp.lt.u32.totalorder %s1266_s20, %s1594_s8 }
  0x29   : > { %p1270_p10 = pneg %p1269_p9  ;;  %p1274_p13 = por %p1273_p11, %p1272_p3 }
  0x2b   : > { %p1276_p1 = por %p1275_p0, %p1274_p13 }
  0x2d   : > { %p1277_p5 = pnand %p1276_p1, %p1270_p10 }
  0x2f   : > { %1280 = shalt.err (!%p1277_p5)
}
  0x30   : > { %s1281_s17 = scalar_lea.vmem %s1596_s24, 512  ;;  %s1428_s23 = smov [#allocation8]  }
  0x31   : > { %p1282_p6 = scmp.ne.s32.totalorder %s1596_s24, %s1281_s17  ;;  %s1286_s26 = sshll.u32 %s1428_s23, 4  ;;  %s1287_s26 = int_to_ptr.vmem [resolvable:$false] %s1286_s26 }
  0x32   : > { %s1288_s27 = scalar_lea.vmem %s1287_s26, 1024  ;;  %p1289_p12 = scmp.lt.s32.totalorder %s1596_s24, %s1287_s26 }
  0x33   : > { %p1284_p9 = pnand %p1282_p6, %p1268_p8  ;;  %p1290_p3 = scmp.lt.s32.totalorder %s1288_s27, %s1281_s17 }
  0x35   : > { %p1285_p2 = pneg %p1284_p9  ;;  %p1291_p11 = por %p1290_p3, %p1289_p12 }
  0x37   : > { %p1292_p13 = pnand %p1291_p11, %p1285_p2 }
  0x39   : > { %1295 = shalt.err (!%p1292_p13)
}
  0x3a   : > { %s1429_s20 = smov 256   ;;  %s1430_s22 = smov 16  }
  0x3b   : > { %1110 = dma.hbm_to_vmem [thread:$0]  (!%p1600_p4), %s1594_s8, 512, %s1596_s24, %s1605_s15, %s1429_s20, %s1429_s20, %s1430_s22  }
  0x3c   : > { %p296_p5 = scmp.lt.s32.totalorder %s1422_s16, 5  ;;  %p1847_p8 = scmp.ge.s32.totalorder %s1422_s16, 1 }
  0x3e   : > { %p297_p10 = pnand %p1847_p8, %p296_p5 }
  0x3f   : > { %s302_s21 = sand.u32 (!%p297_p10), 1, %s1398_s11  }
  0x40   : > { %300 = sbr.rel (%p297_p10) target bundleno = 1194 (0x4aa), region = 52  ;;  %s1010_s17 = sshll.u32 (!%p297_p10), %s302_s21, 5 }
  0x41   : > { %s303_s23 = scalar_lea.sflag (!%p297_p10), [#allocation9], %s302_s21  ;;  %s1637_s26 = scalar_lea.vmem (!%p297_p10), [#allocation8], %s1010_s17 }
  0x47   : > { %1373 = dma.done.wait (%p1564_p7), %s303_s23, 512  }
  0x48   : > { %1375 = vsyncadd (%p1564_p7), %s303_s23, 4294966784  ;;  %s336_s18 = sand.u32 1, %s1386_s30   ;;  %p1012_p12 = scmp.ne.s32.totalorder %s1406_s13, 0 }
  0x49   : > { %s1011_s8 = sshll.u32 %s336_s18, 4  ;;  %v345_v0 = vld [vmem:[%s1637_s26 + $0x8] sm:$0xff] (!%p1012_p12)  ;;  %v347_v1 = vld [vmem:[%s1637_s26 + $0x18] sm:$0xff] (!%p1012_p12)  ;;  %v344_v2 = vld [vmem:[%s1637_s26] sm:$0xff] (!%p1012_p12)  ;;  %v1431_v5 = vmov (!%p1012_p12), 0   ;;  %vm357_vm0 = vcmask (!%p1012_p12), 130048  }
  0x4a   : > { %s1646_s15 = scalar_lea.vmem [#allocation11], %s1011_s8  ;;  %343 = sbr.rel (%p1012_p12) target bundleno = 300 (0x12c), region = 60  ;;  %v349_v3 = vpack.c.bf16 (!%p1012_p12), %v347_v1, %v345_v0  ;;  %v346_v4 = vld [vmem:[%s1637_s26 + $0x10] sm:$0xff] (!%p1012_p12)  ;;  %393 = vmatprep.mubr.bf16.mxu0 (!%p1012_p12), %v1431_v5  ;;  %465 = vmatprep.mubr.bf16.mxu1 (!%p1012_p12), %v1431_v5  ;;  %v414_v9 = vld [vmem:[%s1828_s6 + $0x8] sm:$0xff] (!%p1012_p12) }
  0x4b   : > { %v348_v6 = vpack.c.bf16 (!%p1012_p12), %v346_v4, %v344_v2  ;;  %1226 = vset.pattern.permute.xlu0 (!%p1012_p12), %v1431_v5  ;;  %v351_v7 = vld [vmem:[%s1826_s4] sm:$0xff] (!%p1012_p12)  ;;  %1227 = vset.pattern.permute.xlu1 (!%p1012_p12), %v1431_v5 }
  0x4c   : > { %361 = vmatprep.subr.bf16.mxu0 (!%p1012_p12), %v349_v3  ;;  %433 = vmatprep.subr.bf16.mxu1 (!%p1012_p12), %v349_v3  ;;  %v1228_v8 = vld [vmem:[%s1827_s5] sm:$0xff] (!%p1012_p12)  }
  0x4d   : > { %362 = vmatpush1.bf16.msra.mxu0 (!%p1012_p12), %v348_v6  ;;  %434 = vmatpush1.bf16.msra.mxu1 (!%p1012_p12), %v348_v6  ;;  %v350_v10 = vld [vmem:[%s1825_s3] sm:$0xf] (!%p1012_p12) }
  0x4e   : > { %354 = vperm.xlu0 (!%p1012_p12), %1226, %v351_v7   ;;  %422 = vperm.xlu1 (!%p1012_p12), %1227, %v414_v9   ;;  %v413_v11 = vld [vmem:[%s1828_s6] sm:$0xff] (!%p1012_p12) }
  0x50   : > { %1013 = vmatmul.mubr.msk.bf16.vlgmr.msra.gmra.mrb[0].mxu0 (!%p1012_p12), %vm357_vm0, %v350_v10  ;;  %1016 = vmatmul.mubr.msk.bf16.vlgmr.msra.gmra.mrb[0].mxu1 (!%p1012_p12), %vm357_vm0, %v1228_v8 }
  0x52   : > { %417 = vperm.xlu0 %1226, %v413_v11  }
  0xcd   : > { %v355_v12 = vpop.permute.xlu0 %354  ;;  %v423_v14 = vpop.permute.xlu1 %422 }
  0xd1   : > { %v418_v13 = vpop.permute.xlu0 %417 }
 0x123   : > { %v395_v15 = vpop.f32.mrb[0].mxu0  ;;  %v467_v16 = vpop.f32.mrb[0].mxu1 }
 0x124   : > { %v396_v17 = vadd.f32 %v395_v15, %v355_v12  ;;  %v397_v18 = vpop.f32.mrb[1].mxu0  ;;  %v469_v19 = vpop.f32.mrb[1].mxu1  ;;  %v468_v23 = vadd.f32 %v467_v16, %v418_v13 }
 0x125   : > { %v398_v20 = vadd.f32 %v397_v18, %v355_v12  ;;  %v399_v21 = vpop.f32.mrb[2].mxu0  ;;  %v471_v22 = vpop.f32.mrb[2].mxu1  ;;  %v470_v28 = vadd.f32 %v469_v19, %v418_v13 }
 0x126   : > { %v472_v24 = vadd.f32 %v471_v22, %v423_v14  ;;  %v400_v25 = vpop.f32.mrb[3].mxu0  ;;  %v473_v26 = vpop.f32.mrb[3].mxu1 }
 0x127   : > { %v1037_v27 = vpack.c.bf16 %v398_v20, %v396_v17  ;;  %v474_v29 = vadd.f32 %v473_v26, %v423_v14 }
 0x128   : > { %v476_v30 = vpack.c.bf16 %v472_v24, %v468_v23 }
 0x129   : > { %410 = vst [vmem:[#allocation2] sm:$0xff] %v1037_v27  ;;  %v477_v31 = vpack.c.bf16 %v474_v29, %v470_v28 }
 0x12a   : > { %478 = vst [vmem:[#allocation3] sm:$0xff] %v476_v30 }
 0x12b   : > { %479 = vst [vmem:[#allocation3 + $0x8] sm:$0xff] %v477_v31 }
 0x12c PF: > { %s1017_s24 = sshll.u32 %s1406_s13, 7  ;;  %v1432_v32 = vmov 0.0   ;;  %vm1433_vm1 = vmmov 0   ;;  %v489_v33 = vld [vmem:[%s1824_s2] sm:$0xff]  ;;  %v1434_v34 = vmov 0   ;;  %vm495_vm2 = vcmask 130048  }
 0x12d   : > { %1058 = vmatprep.subr.bf16.mxu0 %v1432_v32  ;;  %541 = vst [vmem:[#allocation5] sm:$0x1] %v1432_v32  ;;  %542 = vst [vmem:[#allocation6] sm:$0xff] %v1432_v32  ;;  %s481_s27 = sshra.s32 %s1017_s24, 7  ;;  %1060 = vmatprep.mubr.msk.bf16.mxu0 %vm1433_vm1, %v1432_v32  ;;  %v487_v38 = vld [vmem:[%s1823_s1] sm:$0xf] }
 0x12e   : > { %543 = vst [vmem:[#allocation6 + $0x8] sm:$0xff] %v1432_v32  ;;  %s1018_s21 = sshll.u32 %s481_s27, 3  ;;  %1229 = vset.pattern.permute.xlu0 %v1434_v34  ;;  %v1435_v39 = vmov -inf  }
 0x12f   : > { %s484_s17 = scalar_lea.vmem %s1637_s26, %s1018_s21 [#allocation8]  ;;  %492 = vperm.xlu0 %1229, %v489_v33   ;;  %540 = vst [vmem:[#allocation4] sm:$0x1] %v1435_v39  ;;  %s1684_s26 = smov 0  }
 0x130   : > { %v1673_v35 = vld [vmem:[%s484_s17] sm:$0xff]  ;;  %v1675_v36 = vld [vmem:[%s484_s17 + $0x10] sm:$0xff] }
 0x131   : > { %v488_v37 = vpack.c.bf16 %v1675_v36, %v1673_v35 }
 0x133   : > { %1059 = vmatpush3.bf16.msra.mxu0 %v488_v37 }
 0x136   : > { %1061 = vmatmul.mubr.msk.bf16.vlgmr.msra.gmra.mrb[0].mxu0 %vm495_vm2, %v487_v38 }
 0x1ae   : > { %v493_v40 = vpop.permute.xlu0 %492 }
 0x209   : > { %v533_v41 = vpop.f32.mrb[0].mxu0 }
 0x20a   : > { %v534_v42 = vadd.f32 %v533_v41, %v493_v40  ;;  %v1062_v43 = vpop.f32.mrb[1].mxu0 }
 0x20b   : > { %v536_v44 = vpop.f32.mrb[2].mxu0 }
 0x20c   : > { %v1682_v45 = vpack.c.bf16 %v534_v42, %v534_v42  ;;  %v1063_v46 = vpop.f32.mrb[3].mxu0 }
 0x20d LB: >> { %vm600_vm3 = vcmask 1043456   ;;  %s1020_s25 = sshll.u32 %s1426_s26, 7  ;;  %vm575_vm4 = vcmask 64512   ;;  %v1436_v57 = vmov 0.0   ;;  %vm1437_vm5 = vmmov 0   ;;  %s549_s26 = sadd.s32 1, %s1426_s26   ;;  %s1426_s26 = sphi %s1684_s26, %s549_s26  }
 0x20e   : >> { %1102 = vmatprep.subr.msk.bf16.mxu0 %vm600_vm3, %v1682_v45  ;;  %v602_v47 = vsel %vm600_vm3, %v1682_v45, 0  ;;  %s1692_s24 = sshra.s32 %s1020_s25, 7  ;;  %1082 = vmatprep.subr.bf16.mxu1 %v1436_v57  ;;  %v728_v27 = vlaneseq  ;;  %v701_v32 = vld [vmem:[#allocation4] sm:$0x1]  ;;  %p546_p7 = scmp.ge.s32.totalorder %s549_s26, 2  }
 0x20f   : >> { %1065 = vmatpush3.bf16.msra.mxu0 %v602_v47  ;;  %s1021_s27 = sshll.u32 %s1692_s24, 2  ;;  %1098 = vmatprep.mubr.msk.bf16.mxu1 %vm1437_vm5, %v1436_v57  ;;  %s1022_s22 = sshll.u32 %s1692_s24, 3 }
 0x210   : >> { %s554_s20 = scalar_lea.vmem [#allocation2], %s1021_s27  ;;  %v729_v30 = vshrl.u32 %v728_v27, 7  ;;  %s557_s21 = scalar_lea.vmem [#allocation3], %s1022_s22 }
 0x211   : >> { %v555_v48 = vld [vmem:[%s554_s20] sm:$0xf]  ;;  %s882_s17 = sld [smem:[#allocation7]] (%p546_p7)  ;;  %s1032_s23 = sshll.u32 (%p546_p7), %s1410_s14, 2 }
 0x212   : >> { %559 = vxpose.xlu0.c.b16.start.end [1/1] (short) %v555_v48, 128  ;;  %v1723_v34 = vsub.s32 0, %v729_v30  ;;  %s902_s8 = sadd.s32 (%p546_p7), %s1406_s13, %s1032_s23  ;;  %s905_s26 = sshll.u32 (%p546_p7), %s1646_s15, 4  ;;  %s1748_s26 = int_to_ptr.vmem [resolvable:$true] %s905_s26 }
 0x213   : > { %s1033_s25 = sshll.u32 (%p546_p7), %s902_s8, 7  ;;  %s1848_s27 = sld [smem:[#allocation18_spill]] (%p546_p7) }
 0x214   : > { %s1761_s13 = scalar_lea.sflag (%p546_p7), [#allocation10], %s336_s18  ;;  %s1296_s22 = scalar_lea.vmem (%p546_p7), %s1748_s26, 256 }
 0x215   : > { %p1297_p2 = scmp.ne.s32.totalorder (%p546_p7), %s1748_s26, %s1296_s22  ;;  %p1849_p4 = scmp.ne.s32.totalorder (%p546_p7), %s1844_s28, 0 }
 0x217   : > { %p1298_p0 = pnand (%p546_p7), %p1297_p2, %p1849_p4 }
 0x219   : > { %s1753_s20 = scalar_lea.hbm (%p546_p7), %s1848_s27, %s1033_s25  ;;  %p1299_p1 = pneg (%p546_p7), %p1298_p0 }
 0x278   : >> { %v567_v49 = vpop.trf.xlu0 }
 0x279   : >> { %1066 = vmatprep.mubr.msk.bf16.mxu0 %vm575_vm4, %v567_v49 }
 0x27c   : >> { %v568_v50 = vpop.trf.xlu0 }
 0x27d   : >> { %1067 = vmatmul.mubr.msk.bf16.vlgmr.msra.gmra.mrb[0].mxu0 %vm575_vm4, %v568_v50 }
 0x280   : >> { %v569_v51 = vpop.trf.xlu0 }
 0x281   : >> { %1070 = vmatprep.mubr.msk.bf16.mxu0 %vm575_vm4, %v569_v51 }
 0x284   : >> { %v570_v52 = vpop.trf.xlu0 }
 0x285   : >> { %1071 = vmatmul.mubr.msk.bf16.gmra.mrb[4].mxu0 %vm575_vm4, %v570_v52 }
 0x288   : >> { %v571_v53 = vpop.trf.xlu0 }
 0x289   : >> { %1074 = vmatprep.mubr.msk.bf16.mxu0 %vm575_vm4, %v571_v53 }
 0x28c   : >> { %v572_v54 = vpop.trf.xlu0 }
 0x28d   : >> { %1075 = vmatmul.mubr.msk.bf16.gmra.mrb[8].mxu0 %vm575_vm4, %v572_v54 }
 0x290   : >> { %v573_v55 = vpop.trf.xlu0 }
 0x291   : >> { %1078 = vmatprep.mubr.msk.bf16.mxu0 %vm575_vm4, %v573_v55 }
 0x294   : >> { %v574_v56 = vpop.trf.xlu0 }
 0x295   : >> { %1079 = vmatmul.mubr.msk.bf16.gmra.mrb[12].mxu0 %vm575_vm4, %v574_v56 }
 0x350   : >> { %v1068_v58 = vpop.f32.mrb[0].mxu0 }
 0x351   : >> { %v638_v59 = vpop.f32.mrb[1].mxu0 }
 0x352   : >> { %v1069_v60 = vpop.f32.mrb[2].mxu0 }
 0x353   : >> { %v641_v61 = vpop.f32.mrb[3].mxu0 }
 0x358   : >> { %v1705_v62 = vpop.f32.mrb[4].mxu0 }
 0x359   : >> { %v704_v63 = vmax.f32 %v1068_v58, %v1705_v62  ;;  %v654_v0 = vpop.f32.mrb[5].mxu0 }
 0x35a   : >> { %v702_v1 = vmax.f32 %v638_v59, %v654_v0  ;;  %v1708_v2 = vpop.f32.mrb[6].mxu0 }
 0x35b   : >> { %v705_v3 = vmax.f32 %v1069_v60, %v1708_v2  ;;  %v657_v4 = vpop.f32.mrb[7].mxu0 }
 0x35c   : >> { %v703_v5 = vmax.f32 %v641_v61, %v657_v4 }
 0x360   : >> { %v1711_v6 = vpop.f32.mrb[8].mxu0 }
 0x361   : >> { %v708_v7 = vmax.f32 %v704_v63, %v1711_v6  ;;  %v670_v8 = vpop.f32.mrb[9].mxu0 }
 0x362   : >> { %v706_v9 = vmax.f32 %v702_v1, %v670_v8  ;;  %v1714_v10 = vpop.f32.mrb[10].mxu0 }
 0x363   : >> { %v709_v11 = vmax.f32 %v705_v3, %v1714_v10  ;;  %v673_v12 = vpop.f32.mrb[11].mxu0 }
 0x364   : >> { %v707_v13 = vmax.f32 %v703_v5, %v673_v12 }
 0x368   : >> { %v1717_v14 = vpop.f32.mrb[12].mxu0 }
 0x369   : >> { %v712_v15 = vmax.f32 %v708_v7, %v1717_v14  ;;  %v686_v16 = vpop.f32.mrb[13].mxu0 }
 0x36a   : >> { %v710_v17 = vmax.f32 %v706_v9, %v686_v16  ;;  %v1720_v18 = vpop.f32.mrb[14].mxu0 }
 0x36b   : >> { %v713_v19 = vmax.f32 %v709_v11, %v1720_v18  ;;  %v689_v20 = vpop.f32.mrb[15].mxu0 }
 0x36c   : >> { %v711_v21 = vmax.f32 %v707_v13, %v689_v20 }
 0x36d   : >> { %v715_v22 = vmax.f32 %v712_v15, %v713_v19 }
 0x36e   : >> { %v714_v23 = vmax.f32 %v710_v17, %v711_v21 }
 0x370   : >> { %v716_v24 = vmax.f32 %v714_v23, %v715_v22 }
 0x372   : >> { %v717_v25 = vrot.slane %v716_v24, 4 }
 0x374   : >> { %v718_v26 = vmax.f32 %v716_v24, %v717_v25 }
 0x376   : >> { %v719_v28 = vrot.slane %v718_v26, 2 }
 0x378   : >> { %v720_v29 = vmax.f32 %v718_v26, %v719_v28 }
 0x37a   : >> { %v721_v31 = vrot.slane %v720_v29, 1 }
 0x37c   : >> { %v722_v33 = vmax.f32 %v720_v29, %v721_v31 }
 0x37e   : >> { %v723_v37 = vmax.f32 %v701_v32, %v722_v33 }
 0x380   : >> { %v731_v38 = vrot.slane %v723_v37, %v1723_v34  ;;  %869 = vst [vmem:[#allocation4] sm:$0x1] %v723_v37 }
 0x382   : >> { %v733_v39 = vsub.f32 %v638_v59, %v731_v38  ;;  %v734_v40 = vsub.f32 %v641_v61, %v731_v38  ;;  %v735_v41 = vsub.f32 %v1068_v58, %v731_v38  ;;  %v736_v42 = vsub.f32 %v1069_v60, %v731_v38 }
 0x383   : >> { %v737_v43 = vsub.f32 %v654_v0, %v731_v38  ;;  %v738_v44 = vsub.f32 %v657_v4, %v731_v38  ;;  %v739_v46 = vsub.f32 %v1705_v62, %v731_v38  ;;  %v740_v47 = vsub.f32 %v1708_v2, %v731_v38 }
 0x384   : >> { %v741_v48 = vsub.f32 %v670_v8, %v731_v38  ;;  %v742_v49 = vsub.f32 %v673_v12, %v731_v38  ;;  %v743_v50 = vsub.f32 %v1711_v6, %v731_v38  ;;  %v744_v51 = vsub.f32 %v1714_v10, %v731_v38 }
 0x385   : >> { %v745_v52 = vsub.f32 %v686_v16, %v731_v38  ;;  %v746_v53 = vsub.f32 %v689_v20, %v731_v38  ;;  %v747_v54 = vsub.f32 %v1717_v14, %v731_v38  ;;  %v749_v55 = vmul.f32 1.442695, %v733_v39 }
 0x386   : >> { %v751_v56 = vmul.f32 1.442695, %v734_v40  ;;  %v753_v58 = vmul.f32 1.442695, %v735_v41  ;;  %v755_v59 = vmul.f32 1.442695, %v736_v42  ;;  %v748_v60 = vsub.f32 %v1720_v18, %v731_v38 }
 0x387   : >> { %1230 = vpow2.f32 %v749_v55  ;;  %v757_v61 = vmul.f32 1.442695, %v737_v43  ;;  %v759_v62 = vmul.f32 1.442695, %v738_v44  ;;  %v761_v63 = vmul.f32 1.442695, %v739_v46 }
 0x388   : >> { %1232 = vpow2.f32 %v751_v56  ;;  %v763_v0 = vmul.f32 1.442695, %v740_v47  ;;  %v765_v1 = vmul.f32 1.442695, %v741_v48  ;;  %v767_v2 = vmul.f32 1.442695, %v742_v49 }
 0x389   : >> { %1234 = vpow2.f32 %v753_v58  ;;  %v769_v3 = vmul.f32 1.442695, %v743_v50  ;;  %v771_v4 = vmul.f32 1.442695, %v744_v51  ;;  %v773_v5 = vmul.f32 1.442695, %v745_v52 }
 0x38a   : >> { %1236 = vpow2.f32 %v755_v59  ;;  %v724_v6 = vsub.f32 %v701_v32, %v723_v37  ;;  %v775_v7 = vmul.f32 1.442695, %v746_v53  ;;  %v777_v9 = vmul.f32 1.442695, %v747_v54  ;;  %v558_v58 = vld [vmem:[%s557_s21] sm:$0xff]  ;;  %s1438_s21 = smov (%p546_p7), [#allocation11]  }
 0x38b   : >> { %1238 = vpow2.f32 %v757_v61  ;;  %v779_v11 = vmul.f32 1.442695, %v748_v60 }
 0x38c   : >> { %1240 = vpow2.f32 %v759_v62  ;;  %v725_v15 = vmul.f32 1.442695, %v724_v6  ;;  %v781_v62 = vld [vmem:[#allocation5] sm:$0x1] }
 0x38d   : >> { %1242 = vpow2.f32 %v761_v63 }
 0x38e   : >> { %1244 = vpow2.f32 %v763_v0 }
 0x38f   : >> { %1246 = vpow2.f32 %v765_v1 }
 0x390   : >> { %1248 = vpow2.f32 %v767_v2 }
 0x391   : >> { %v1231_v8 = vpop.eup %1230  ;;  %1250 = vpow2.f32 %v769_v3  ;;  %v806_v3 = vld [vmem:[#allocation6] sm:$0xff] }
 0x392   : >> { %v1233_v10 = vpop.eup %1232  ;;  %1252 = vpow2.f32 %v771_v4  ;;  %v807_v4 = vld [vmem:[#allocation6 + $0x8] sm:$0xff] }
 0x393   : >> { %v1235_v12 = vpop.eup %1234  ;;  %1254 = vpow2.f32 %v773_v5  ;;  %v783_v13 = vadd.f32 %v1233_v10, %v1231_v8  ;;  %v816_v14 = vpack.c.bf16 %v1233_v10, %v1231_v8 }
 0x394   : >> { %v1237_v16 = vpop.eup %1236  ;;  %1256 = vpow2.f32 %v775_v7 }
 0x395   : >> { %v1239_v17 = vpop.eup %1238  ;;  %1258 = vpow2.f32 %v777_v9  ;;  %v784_v18 = vadd.f32 %v1235_v12, %v783_v13  ;;  %1083 = vmatpush3.bf16.msra.mxu1 %v816_v14  ;;  %v817_v19 = vpack.c.bf16 %v1237_v16, %v1235_v12 }
 0x396   : >> { %v1241_v20 = vpop.eup %1240  ;;  %1084 = vmatprep.subr.bf16.mxu1 %v1436_v57  ;;  %1260 = vpow2.f32 %v779_v11 }
 0x397   : >> { %v1243_v21 = vpop.eup %1242  ;;  %v785_v22 = vadd.f32 %v1237_v16, %v784_v18  ;;  %v818_v23 = vpack.c.bf16 %v1241_v20, %v1239_v17  ;;  %1262 = vpow2.f32 %v725_v15 }
 0x398   : >> { %v1245_v24 = vpop.eup %1244 }
 0x399   : >> { %v1247_v25 = vpop.eup %1246  ;;  %v786_v26 = vadd.f32 %v1239_v17, %v785_v22  ;;  %1085 = vmatpush3.bf16.msra.mxu1 %v817_v19  ;;  %v819_v27 = vpack.c.bf16 %v1245_v24, %v1243_v21  ;;  %v883_v17 = vstv (%p546_p7), %s882_s17  ;;  %s1300_s17 = sshll.u32 (%p546_p7), %s1438_s21, 4  ;;  %s1301_s17 = int_to_ptr.vmem [resolvable:$false] %s1300_s17 }
 0x39a   : >> { %v1249_v28 = vpop.eup %1248  ;;  %1086 = vmatprep.subr.bf16.mxu1 %v1436_v57  ;;  %s1302_s23 = scalar_lea.vmem (%p546_p7), %s1301_s17, 512  ;;  %p1303_p6 = scmp.lt.s32.totalorder (%p546_p7), %s1748_s26, %s1301_s17 }
 0x39b   : >> { %v1251_v29 = vpop.eup %1250  ;;  %v787_v30 = vadd.f32 %v1241_v20, %v786_v26  ;;  %v820_v31 = vpack.c.bf16 %v1249_v28, %v1247_v25  ;;  %p1304_p9 = scmp.lt.s32.totalorder (%p546_p7), %s1302_s23, %s1296_s22 }
 0x39c   : >> { %v1253_v32 = vpop.eup %1252 }
 0x39d   : >> { %v1255_v33 = vpop.eup %1254  ;;  %v788_v37 = vadd.f32 %v1243_v21, %v787_v30  ;;  %1087 = vmatpush3.bf16.msra.mxu1 %v818_v23  ;;  %v821_v38 = vpack.c.bf16 %v1253_v32, %v1251_v29  ;;  %p1305_p3 = por (%p546_p7), %p1304_p9, %p1303_p6 }
 0x39e   : >> { %v1257_v39 = vpop.eup %1256  ;;  %1088 = vmatprep.subr.bf16.mxu1 %v1436_v57 }
 0x39f   : >> { %v1259_v40 = vpop.eup %1258  ;;  %v789_v41 = vadd.f32 %v1245_v24, %v788_v37  ;;  %v822_v42 = vpack.c.bf16 %v1257_v39, %v1255_v33  ;;  %p1306_p11 = pnand (%p546_p7), %p1305_p3, %p1299_p1 }
 0x3a0   : >> { %v1261_v43 = vpop.eup %1260 }
 0x3a1   : >> { %v1263_v44 = vpop.eup %1262  ;;  %v790_v46 = vadd.f32 %v1247_v25, %v789_v41  ;;  %1089 = vmatpush3.bf16.msra.mxu1 %v819_v27  ;;  %v823_v47 = vpack.c.bf16 %v1261_v43, %v1259_v40 }
 0x3a2   : >> { %1090 = vmatprep.subr.bf16.mxu1 %v1436_v57  ;;  %v812_v48 = vrot.slane %v1263_v44, %v1723_v34  ;;  %v782_v1 = vmul.f32 %v1263_v44, %v781_v62 }
 0x3a3   : >> { %v791_v49 = vadd.f32 %v1249_v28, %v790_v46 }
 0x3a4   : >> { %v814_v5 = vmul.f32 %v812_v48, %v806_v3  ;;  %v815_v8 = vmul.f32 %v812_v48, %v807_v4 }
 0x3a5   : >> { %v792_v50 = vadd.f32 %v1251_v29, %v791_v49  ;;  %1091 = vmatpush3.bf16.msra.mxu1 %v820_v31 }
 0x3a6   : >> { %1092 = vmatprep.subr.bf16.mxu1 %v1436_v57 }
 0x3a7   : >> { %v793_v51 = vadd.f32 %v1253_v32, %v792_v50 }
 0x3a9   : >> { %v794_v52 = vadd.f32 %v1255_v33, %v793_v51  ;;  %1093 = vmatpush3.bf16.msra.mxu1 %v821_v38 }
 0x3aa   : >> { %1094 = vmatprep.subr.bf16.mxu1 %v1436_v57 }
 0x3ab   : >> { %v795_v53 = vadd.f32 %v1257_v39, %v794_v52 }
 0x3ad   : >> { %v796_v54 = vadd.f32 %v1259_v40, %v795_v53  ;;  %1095 = vmatpush3.bf16.msra.mxu1 %v822_v42 }
 0x3ae   : >> { %1096 = vmatprep.subr.bf16.mxu1 %v1436_v57 }
 0x3af   : >> { %v797_v55 = vadd.f32 %v1261_v43, %v796_v54 }
 0x3b1   : >> { %v798_v56 = vrot.slane %v797_v55, 4  ;;  %1097 = vmatpush3.bf16.msra.mxu1 %v823_v47 }
 0x3b3   : >> { %v799_v59 = vadd.f32 %v798_v56, %v797_v55 }
 0x3b4   : >> { %1099 = vmatmul.mubr.bf16.vlgmr.msra.gmra.mrb[0].mxu1 %v558_v58 }
 0x3b5   : >> { %v800_v60 = vrot.slane %v799_v59, 2 }
 0x3b7   : >> { %v801_v61 = vadd.f32 %v800_v60, %v799_v59 }
 0x3b9   : >> { %v802_v63 = vrot.slane %v801_v61, 1 }
 0x3bb   : >> { %v803_v0 = vadd.f32 %v802_v63, %v801_v61 }
 0x3bd   : >> { %v804_v2 = vadd.f32 %v803_v0, %v782_v1 }
 0x3bf   : >> { %805 = vst [vmem:[#allocation5] sm:$0x1] %v804_v2 }
 0x3c6   : > { %v870_v12 = vld [vmem:[#allocation5] sm:$0x1] (%p546_p7) }
 0x3c7   : > { %1264 = vrcp.f32 (%p546_p7), %v870_v12 }
 0x3d1   : > { %v1265_v13 = vpop.eup (%p546_p7), %1264 }
 0x3d2   : > { %v878_v16 = vrot.slane (%p546_p7), %v1265_v13, %v1723_v34 }
 0x486   : > { %548 = sbr.rel (!%p546_p7) target bundleno = 525 (0x20d), region = 111 }
 0x487   : >> { %v858_v6 = vpop.f32.mrb[0].mxu1 }
 0x488   : >> { %v865_v57 = vadd.f32 %v858_v6, %v814_v5  ;;  %v1100_v7 = vpop.f32.mrb[1].mxu1 }
 0x489   : >> { %v861_v9 = vpop.f32.mrb[2].mxu1 }
 0x48a   : >> { %867 = vst [vmem:[#allocation6] sm:$0xff] %v865_v57  ;;  %v866_v10 = vadd.f32 %v861_v9, %v815_v8  ;;  %v1101_v11 = vpop.f32.mrb[3].mxu1 }
 0x48c   : >> { %868 = vst [vmem:[#allocation6 + $0x8] sm:$0xff] %v866_v10 }
 0x491   : > { %v872_v14 = vld [vmem:[#allocation6] sm:$0xff] }
 0x492   : > { %v880_v18 = vmul.f32 %v878_v16, %v872_v14 }
 0x493   : > { %v873_v15 = vld [vmem:[#allocation6 + $0x8] sm:$0xff] }
 0x494   : > { %v881_v45 = vmul.f32 %v878_v16, %v873_v15  ;;  %v884_v19 = vmul.f32 %v883_v17, %v880_v18 }
 0x496   : > { %v885_v20 = vmul.f32 %v883_v17, %v881_v45  ;;  %v886_v34 = vadd.f32 %v884_v19, %v1673_v35 }
 0x498   : > { %v887_v21 = vadd.f32 %v885_v20, %v1675_v36  ;;  %888 = vst [vmem:[%s1646_s15] sm:$0xff] %v886_v34 }
 0x49a   : > { %889 = vst [vmem:[%s1646_s15 + $0x8] sm:$0xff] %v887_v21 }
 0x49b   : > { %1309 = shalt.err (!%p1306_p11)
}
 0x49c   : > { %s1310_s18 = scalar_lea.hbm %s1753_s20, 256  ;;  %s1314_s25 = scalar_lea.hbm %s1848_s27, 1024 }
 0x49d   : > { %p1311_p13 = scmp.ne.s32.totalorder %s1753_s20, %s1310_s18  ;;  %p1315_p10 = scmp.lt.u32.totalorder %s1753_s20, %s1848_s27 }
 0x49e   : > { %p1316_p12 = scmp.lt.u32.totalorder %s1314_s25, %s1310_s18  ;;  %p1318_p2 = scmp.lt.u32.totalorder %s1310_s18, %s1753_s20 }
 0x49f   : > { %p1312_p5 = pnand %p1311_p13, %p1849_p4 }
 0x4a0   : > { %p1317_p7 = por %p1316_p12, %p1315_p10 }
 0x4a1   : > { %p1313_p8 = pneg %p1312_p5 }
 0x4a2   : > { %p1319_p0 = por %p1318_p2, %p1317_p7 }
 0x4a4   : > { %p1320_p1 = pnand %p1319_p0, %p1313_p8 }
 0x4a6   : > { %1323 = shalt.err (!%p1320_p1)
}
 0x4a7   : > { %s1439_s22 = smov 128   ;;  %s1440_s21 = smov 256  }
 0x4a8   : > { %s1441_s17 = smov 8  }
 0x4a9   : > { %1105 = dma.vmem_to_hbm [thread:$0]  (%p1849_p4), %s1748_s26, 256, %s1753_s20, %s1761_s13, %s1439_s22, %s1440_s21, %s1441_s17  }
 0x4aa PF: > { %p1116_p6 = scmp.ge.s32.totalorder %s1422_s16, 2  ;;  %s920_s23 = sand.u32 1, %s1382_s29  }
 0x4ab   : > { %p1850_p9 = scmp.ne.s32.totalorder %s1845_s7, 0  ;;  %s921_s18 = scalar_lea.sflag [#allocation10], %s920_s23 }
 0x4ad   : > { %p1112_p3 = pnand %p1116_p6, %p1850_p9 }
 0x4af   : > { %1377 = dma.done.wait (!%p1112_p3), %s921_s18, 256  }
 0x4b0   : > { %1379 = vsyncadd (!%p1112_p3), %s921_s18, 4294967040  ;;  %s25_s16 = sadd.s32 1, %s1422_s16   ;;  %s1851_s28 = smov %s1577_s10 }
 0x4b1   : > { %p22_p11 = scmp.ge.s32.totalorder %s25_s16, 6   ;;  %s1852_s13 = sld [smem:[#allocation14_spill]] }
 0x4b2   : > { %s1853_s14 = sld [smem:[#allocation15_spill]]  ;;  %s1854_s7 = sld [smem:[#allocation16_spill]] }
 0x4b3   : > { %s1855_s15 = sld [smem:[#allocation17_spill]]  ;;  %s1856_s29 = smov %s1386_s30 }
 0x4b4   : > { %s1857_s30 = smov %s1390_s9  ;;  %s1858_s9 = smov %s1580_s19 }
 0x4b5   : > { %s1859_s10 = smov %s1398_s11  ;;  %s1860_s11 = smov %s1402_s12 }
 0x4b6   : > { %s1861_s12 = smov %s1851_s28  ;;  %24 = sbr.rel (!%p22_p11) target bundleno = 12 (0xc), region = 122 }
 0x4bd   :  { %926 = vsyncpa [#allocation9], 1 }
 0x4be   :  { %928 = vsyncpa [#allocation9 + $0x1], 1 }
 0x4bf   :  { %929 = vsyncpa [#allocation10], 1 }
 0x4c0   :  { %931 = vsyncpa [#allocation10 + $0x1], 1 }

</bundles_post_ra>
